<compile_context>
chip_gen: v7x
topology: tpu7x:2x2x1
jax: 0.10.0
libtpu: 0.0.40
codegen_flags: <defaults>
</compile_context>

<pallas_src>
import jax
import jax.numpy as jnp
from jax.experimental import pallas as pl
from jax.experimental.pallas import tpu as pltpu


def _basic_attention_kernel(x_ref, w_ref, b_ref, ctx_ref, attn_ref):
    # x_ref:    (B_blk, S, H)  text_hidden tile (VMEM)
    # w_ref:    (1, H)         linear weight row (VMEM)
    # b_ref:    (1,)           linear bias (SMEM scalar)
    # ctx_ref:  (B_blk, H)     context-vector output tile
    # attn_ref: (B_blk, S)     attention-weights output tile
    x = x_ref[...].astype(jnp.float32)                        # (B_blk, S, H)
    w = w_ref[...].astype(jnp.float32).reshape(1, 1, -1)      # (1, 1, H), hoisted once
    b = b_ref[0]                                              # scalar from SMEM

    # scores = x @ W^T + b, computed lane-dense as a VPU mul + lane reduce.
    scores = jnp.sum(x * w, axis=-1) + b                      # (B_blk, S)

    # softmax over the sequence axis (PyTorch dim=1), at full vreg width.
    m = jnp.max(scores, axis=-1, keepdims=True)               # (B_blk, 1)
    e = jnp.exp(scores - m)                                   # (B_blk, S)
    denom = jnp.sum(e, axis=-1, keepdims=True)                # (B_blk, 1)
    attn = e * pl.reciprocal(denom, approx=False)             # (B_blk, S)

    # context = sum_s attn[b, s] * x[b, s, :]  (broadcast-mul + sublane reduce,
    # no M=1 MXU matmul, no transposes).
    ctx = jnp.sum(jnp.expand_dims(attn, -1) * x, axis=1)      # (B_blk, H)

    ctx_ref[...] = ctx.astype(ctx_ref.dtype)
    attn_ref[...] = attn.astype(attn_ref.dtype)


def _pick_batch_block(B, S, H, dtype_bytes, target_bytes):
    """Largest batch block whose x tile is <= target_bytes, subject to the TPU
    sublane rule (output block dim divisible by 8, or equal to the full dim)."""
    row_bytes = S * H * dtype_bytes
    max_blk = max(1, target_bytes // max(1, row_bytes))
    if B <= max_blk:
        return B                          # whole batch per step (== full dim, legal)
    best = None
    d = 8
    limit = min(B, max_blk)
    while d <= limit:                     # largest multiple-of-8 divisor of B
        if B % d == 0:
            best = d
        d += 8
    if best is not None:
        return best
    # No multiple-of-8 divisor fits the target; fall back to the full batch so
    # the output block dims equal the array dims (always layout-legal).
    return B


def basic_attention(text_hidden, weight, bias, *, target_block_bytes=8 << 20):
    """text_hidden: (B, S, H); weight: (1, H) like nn.Linear(H, 1); bias: (1,)."""
    B, S, H = text_hidden.shape
    dtype_bytes = jnp.dtype(text_hidden.dtype).itemsize
    b_blk = _pick_batch_block(B, S, H, dtype_bytes, target_block_bytes)
    grid = (B // b_blk,)

    w_row = weight.reshape(1, H)          # nn.Linear weight (1, H), kept as a row
    b_vec = bias.reshape(1)               # scalar bias -> SMEM

    ctx, attn = pl.pallas_call(
        _basic_attention_kernel,
        out_shape=(
            jax.ShapeDtypeStruct((B, H), text_hidden.dtype),
            jax.ShapeDtypeStruct((B, S), text_hidden.dtype),
        ),
        grid_spec=pltpu.PrefetchScalarGridSpec(
            num_scalar_prefetch=0,
            grid=grid,
            in_specs=[
                pl.BlockSpec((b_blk, S, H), lambda i: (i, 0, 0)),
                pl.BlockSpec((1, H), lambda i: (0, 0)),
                pl.BlockSpec(memory_space=pltpu.MemorySpace.SMEM),
            ],
            out_specs=[
                pl.BlockSpec((b_blk, H), lambda i: (i, 0)),
                pl.BlockSpec((b_blk, S), lambda i: (i, 0)),
            ],
        ),
        compiler_params=pltpu.CompilerParams(
            dimension_semantics=("parallel",),
            vmem_limit_bytes=48 * 1024 * 1024,
        ),
    )(text_hidden, w_row, b_vec)

    return ctx, attn


def _reference(text_hidden, weight, bias):
    scores = jnp.einsum("bsh,oh->bso", text_hidden, weight)[..., 0] + bias[0]
    attn = jax.nn.softmax(scores, axis=1)
    ctx = jnp.einsum("bs,bsh->bh", attn, text_hidden)
    return ctx, attn


if __name__ == "__main__":
    B, S, H = 2, 8, 32
    key = jax.random.PRNGKey(0)
    k_x, k_w, k_b = jax.random.split(key, 3)

    text_hidden = jax.random.normal(k_x, (B, S, H), dtype=jnp.float32)
    # deterministic nn.Linear(hidden_size, 1) params: weight (1, H), bias (1,)
    bound = 1.0 / (H ** 0.5)
    weight = jax.random.uniform(k_w, (1, H), jnp.float32, -bound, bound)
    bias = jax.random.uniform(k_b, (1,), jnp.float32, -bound, bound)

    ctx, attn = basic_attention(text_hidden, weight, bias)
    jax.block_until_ready((ctx, attn))

    ctx_ref, attn_ref = _reference(text_hidden, weight, bias)
    assert jnp.allclose(ctx, ctx_ref, atol=1e-5, rtol=1e-5)
    assert jnp.allclose(attn, attn_ref, atol=1e-5, rtol=1e-5)

    print("KERNEL_OK")
</pallas_src>

<mosaic_0001>
module attributes {stable_mosaic.version = 11 : i64} {
  func.func @_basic_attention_kernel(%arg0: i32, %arg1: memref<2x8x32xf32, #tpu.memory_space<vmem>>, %arg2: memref<1x32xf32, #tpu.memory_space<vmem>>, %arg3: memref<1xf32, #tpu.memory_space<smem>>, %arg4: memref<2x32xf32, #tpu.memory_space<vmem>>, %arg5: memref<2x8xf32, #tpu.memory_space<vmem>>) attributes {dimension_semantics = [#tpu.dimension_semantics<parallel>], iteration_bounds = array<i64: 1>, scalar_prefetch = 0 : i64, scratch_operands = 0 : i64, tpu.core_type = #tpu.core_type<tc>, window_params = [{transform_indices = @transform_0, window_bounds = array<i64: 2, 8, 32>}, {pipeline_mode = #tpu.pipeline_mode<synchronous>, transform_indices = @transform_1, window_bounds = array<i64: 1, 32>}, {transform_indices = @transform_2, window_bounds = array<i64: 1>}, {transform_indices = @transform_3, window_bounds = array<i64: 2, 32>}, {transform_indices = @transform_4, window_bounds = array<i64: 2, 8>}]} {
    %c0 = arith.constant 0 : index
    %c0_0 = arith.constant 0 : index
    %c0_1 = arith.constant 0 : index
    %0 = vector.load %arg1[%c0, %c0_0, %c0_1] : memref<2x8x32xf32, #tpu.memory_space<vmem>>, vector<2x8x32xf32>
    %c0_2 = arith.constant 0 : index
    %c0_3 = arith.constant 0 : index
    %1 = vector.load %arg2[%c0_2, %c0_3] : memref<1x32xf32, #tpu.memory_space<vmem>>, vector<1x32xf32>
    %2 = vector.shape_cast %1 : vector<1x32xf32> to vector<1x1x32xf32>
    %c0_4 = arith.constant 0 : index
    %3 = memref.load %arg3[%c0_4] : memref<1xf32, #tpu.memory_space<smem>>
    %4 = vector.broadcast %2 : vector<1x1x32xf32> to vector<2x8x32xf32>
    %5 = arith.mulf %0, %4 : vector<2x8x32xf32>
    %cst = arith.constant dense<0.000000e+00> : vector<2x8xf32>
    %6 = vector.multi_reduction <add>, %5, %cst [2] : vector<2x8x32xf32> to vector<2x8xf32>
    %7 = vector.broadcast %3 : f32 to vector<2x8xf32>
    %8 = arith.addf %6, %7 : vector<2x8xf32>
    %cst_5 = arith.constant dense<0xFF800000> : vector<2xf32>
    %9 = vector.multi_reduction <maximumf>, %8, %cst_5 [1] : vector<2x8xf32> to vector<2xf32>
    %10 = vector.shape_cast %9 : vector<2xf32> to vector<2x1xf32>
    %11 = vector.broadcast %10 : vector<2x1xf32> to vector<2x8xf32>
    %12 = arith.subf %8, %11 : vector<2x8xf32>
    %13 = math.exp %12 : vector<2x8xf32>
    %cst_6 = arith.constant dense<0.000000e+00> : vector<2xf32>
    %14 = vector.multi_reduction <add>, %13, %cst_6 [1] : vector<2x8xf32> to vector<2xf32>
    %15 = vector.shape_cast %14 : vector<2xf32> to vector<2x1xf32>
    %16 = tpu.reciprocal %15 : vector<2x1xf32> -> vector<2x1xf32>
    %17 = vector.broadcast %16 : vector<2x1xf32> to vector<2x8xf32>
    %18 = arith.mulf %13, %17 : vector<2x8xf32>
    %19 = vector.shape_cast %18 : vector<2x8xf32> to vector<2x8x1xf32>
    %20 = vector.broadcast %19 : vector<2x8x1xf32> to vector<2x8x32xf32>
    %21 = arith.mulf %20, %0 : vector<2x8x32xf32>
    %cst_7 = arith.constant dense<0.000000e+00> : vector<2x32xf32>
    %22 = vector.multi_reduction <add>, %21, %cst_7 [1] : vector<2x8x32xf32> to vector<2x32xf32>
    %c0_8 = arith.constant 0 : index
    %c0_9 = arith.constant 0 : index
    %23 = vector.load %arg4[%c0_8, %c0_9] : memref<2x32xf32, #tpu.memory_space<vmem>>, vector<2x32xf32>
    tpu.vector_store %arg4[%c0_8, %c0_9], %22 {strides = array<i32>} : memref<2x32xf32, #tpu.memory_space<vmem>>, vector<2x32xf32>,
    %c0_10 = arith.constant 0 : index
    %c0_11 = arith.constant 0 : index
    %24 = vector.load %arg5[%c0_10, %c0_11] : memref<2x8xf32, #tpu.memory_space<vmem>>, vector<2x8xf32>
    tpu.vector_store %arg5[%c0_10, %c0_11], %18 {strides = array<i32>} : memref<2x8xf32, #tpu.memory_space<vmem>>, vector<2x8xf32>,
    return
  }
  func.func @transform_0(%arg0: i32) -> (i32, i32, i32) {
    %c0_i32 = arith.constant 0 : i32
    %c0_i32_0 = arith.constant 0 : i32
    %c0_i32_1 = arith.constant 0 : i32
    return %arg0, %c0_i32, %c0_i32_0 : i32, i32, i32
  }
  func.func @transform_1(%arg0: i32) -> (i32, i32) {
    %c0_i32 = arith.constant 0 : i32
    %c0_i32_0 = arith.constant 0 : i32
    %c0_i32_1 = arith.constant 0 : i32
    return %c0_i32, %c0_i32_0 : i32, i32
  }
  func.func @transform_2(%arg0: i32) -> i32 {
    %c0_i32 = arith.constant 0 : i32
    %c0_i32_0 = arith.constant 0 : i32
    return %c0_i32 : i32
  }
  func.func @transform_3(%arg0: i32) -> (i32, i32) {
    %c0_i32 = arith.constant 0 : i32
    %c0_i32_0 = arith.constant 0 : i32
    return %arg0, %c0_i32 : i32, i32
  }
  func.func @transform_4(%arg0: i32) -> (i32, i32) {
    %c0_i32 = arith.constant 0 : i32
    %c0_i32_0 = arith.constant 0 : i32
    return %arg0, %c0_i32 : i32, i32
  }
}

</mosaic_0001>

<bundles_post_ra>
// kernel: tpu_custom_call.1
= control target key start
LH: loop header
LB: loop body
LE: loop exit
PB: predicated region body
PF: predicated region fallthrough
CT: control target
= control target key end

     0   :  { %11 = vsyncpa [#allocation4], 0  ;;  %s373_s0 = inlined_call_operand.hbm [shape: f32[2,8,32], index: 0, kind: input, shape index: {}]   ;;  %s374_s1 = inlined_call_operand.vmem [shape: f32[1,32], index: 1, kind: input, shape index: {}]   ;;  %s375_s2 = inlined_call_operand.<no memory space> [shape: f32[1], index: 2, kind: input, shape index: {}]   ;;  %s376_s3 = inlined_call_operand.hbm [shape: f32[2,32], index: 3, kind: output, shape index: {0}]   ;;  %s377_s4 = inlined_call_operand.hbm [shape: f32[2,8], index: 4, kind: output, shape index: {1}]  }
   0x1   :  { %12 = vsyncpa [#allocation5], 0 }
   0x2   :  { %13 = vsyncpa [#allocation8], 0  ;;  %s285_s15 = smov [#allocation3]   ;;  %s213_s19 = scalar_lea.hbm %s373_s0, 256 }
   0x3   :  { %s19_s16 = sshll.u32 %s285_s15, 4  ;;  %p214_p0 = scmp.ne.s32.totalorder %s373_s0, %s213_s19  ;;  %s20_s16 = int_to_ptr.vmem [resolvable:$true] %s19_s16 }
   0x4   :  { %p217_p1 = scmp.lt.u32.totalorder %s213_s19, %s373_s0 }
   0x6   :  { %p219_p2 = pnand %p217_p1, %p214_p0 }
   0x8   :  { %222 = shalt.err (!%p219_p2)
}
   0x9   :  { %s223_s24 = scalar_lea.vmem %s20_s16, 256  ;;  %p228_p4 = scmp.lt.s32.totalorder %s20_s16, %s20_s16 }
   0xa   :  { %p224_p3 = scmp.ne.s32.totalorder %s20_s16, %s223_s24  ;;  %p229_p5 = scmp.lt.s32.totalorder %s223_s24, %s223_s24 }
   0xc   :  { %p230_p6 = por %p229_p5, %p228_p4 }
   0xe   :  { %p231_p7 = pnand %p230_p6, %p224_p3 }
  0x10   :  { %234 = shalt.err (!%p231_p7)
}
  0x11   :  { %s286_s25 = smov 128   ;;  %s287_s26 = smov 8  }
  0x12   :  { %25 = dma.hbm_to_vmem [thread:$0]  %s373_s0, 256, %s20_s16, [#allocation4], %s286_s25, %s286_s25, %s287_s26  }
  0x13   :  { %279 = dma.done.wait [#allocation4], 256  }
  0x14   :  { %280 = vsyncadd [#allocation4], 4294967040  ;;  %v33_v0 = vld [vmem:[#allocation3] sm:$0xff]  ;;  %vm45_vm0 = vcmask 261120   ;;  %v331_v2 = vld [vmem:[#allocation3 + $0x8] sm:$0xff]  ;;  %v57_v7 = vlaneseq  ;;  %v52_v10 = vstv %s375_s2  ;;  %vm67_vm1 = vcmask 1041409  }
  0x15   :  { %v198_v1 = vld [vmem:[%s374_s1] ss:$0 sm:$0xff]  ;;  %vm70_vm2 = vcmask 58368   ;;  %v288_v20 = vmov 0   ;;  %s289_s1 = smov [#allocation7]  }
  0x16   :  { %v43_v3 = vmul.f32 %v198_v1, %v33_v0  ;;  %v44_v4 = vmul.f32 %v198_v1, %v331_v2  ;;  %v58_v8 = vand.u32 127, %v57_v7  ;;  %v60_v9 = vshrl.u32 %v57_v7, 7  ;;  %206 = vset.pattern.permute.xlu0 %v288_v20  ;;  %205 = vset.pattern.permute.xlu1 %v288_v20  ;;  %s185_s2 = sshll.u32 %s289_s1, 4  ;;  %s186_s2 = int_to_ptr.vmem [resolvable:$true] %s185_s2 }
  0x17   :  { %s235_s6 = scalar_lea.vmem %s186_s2, 32  ;;  %p240_p9 = scmp.lt.s32.totalorder %s186_s2, %s186_s2 }
  0x18   :  { %v46_v5 = vsel %vm45_vm0, %v43_v3, 0.0  ;;  %v49_v6 = vsel %vm45_vm0, %v44_v4, 0.0  ;;  %v61_v12 = vsub.s32 %v58_v8, %v60_v9  ;;  %v77_v21 = vsub.s32 0, %v60_v9  ;;  %p236_p8 = scmp.ne.s32.totalorder %s186_s2, %s235_s6  ;;  %p241_p10 = scmp.lt.s32.totalorder %s235_s6, %s235_s6 }
  0x19   :  { %47 = vadd.xlane.f32.xlu0 %v46_v5  ;;  %v81_v22 = vsub.s32 1, %v60_v9 }
  0x1a   :  { %p242_p11 = por %p241_p10, %p240_p9 }
  0x1c   :  { %p243_p12 = pnand %p242_p11, %p236_p8 }
  0x1d   :  { %50 = vadd.xlane.f32.xlu0 %v49_v6 }
  0xa6   :  { %v48_v11 = vpop.xlane.xlu0 %47 }
  0xa7   :  { %v53_v13 = vadd.f32 %v52_v10, %v48_v11 }
  0xa9   :  { %v62_v16 = vrot.slane %v53_v13, %v61_v12 }
  0xaa   :  { %v51_v14 = vpop.xlane.xlu0 %50 }
  0xab   :  { %v54_v15 = vadd.f32 %v52_v10, %v51_v14 }
  0xad   :  { %v66_v17 = vrot.slane %v54_v15, %v61_v12 }
  0xaf   :  { %v68_v18 = vsel %vm67_vm1, %v66_v17, %v62_v16 }
  0xb0   :  { %v71_v19 = vsel %vm70_vm2, %v68_v18, -inf }
  0xb1   :  { %72 = vmax.xlane.f32.xlu1 %v71_v19 }
 0x13e   :  { %v73_v23 = vpop.xlane.xlu1 %72 }
 0x13f   :  { %v78_v24 = vrot.slane %v73_v23, %v77_v21  ;;  %v82_v25 = vrot.slane %v73_v23, %v81_v22 }
 0x141   :  { %v85_v26 = vsub.f32 %v53_v13, %v78_v24  ;;  %v86_v27 = vsub.f32 %v54_v15, %v82_v25 }
 0x143   :  { %v87_v28 = vmul.f32 1.442695, %v85_v26  ;;  %v89_v29 = vmul.f32 1.442695, %v86_v27 }
 0x145   :  { %207 = vpow2.f32 %v87_v28 }
 0x146   :  { %209 = vpow2.f32 %v89_v29 }
 0x14f   :  { %v208_v30 = vpop.eup %207 }
 0x150   :  { %v210_v31 = vpop.eup %209  ;;  %94 = vperm.xlu1 %205, %v208_v30  }
 0x151   :  { %97 = vperm.xlu0 %206, %v210_v31  }
 0x1cf   :  { %v95_v32 = vpop.permute.xlu1 %94 }
 0x1d0   :  { %v98_v33 = vpop.permute.xlu0 %97  ;;  %v102_v34 = vrot.slane %v95_v32, %v61_v12 }
 0x1d1   :  { %v106_v35 = vrot.slane %v98_v33, %v61_v12 }
 0x1d3   :  { %v107_v36 = vsel %vm67_vm1, %v106_v35, %v102_v34 }
 0x1d4   :  { %v109_v37 = vsel %vm70_vm2, %v107_v36, 0.0 }
 0x1d5   :  { %110 = vadd.xlane.f32.xlu1 %v109_v37 }
 0x262   :  { %v111_v38 = vpop.xlane.xlu1 %110 }
 0x263   :  { %211 = vrcp.f32 %v111_v38 }
 0x26d   :  { %v212_v39 = vpop.eup %211 }
 0x26e   :  { %v117_v40 = vrot.slane %v212_v39, %v77_v21  ;;  %v121_v42 = vrot.slane %v212_v39, %v81_v22 }
 0x270   :  { %v124_v41 = vmul.f32 %v208_v30, %v117_v40  ;;  %v125_v43 = vmul.f32 %v210_v31, %v121_v42 }
 0x272   :  { %128 = vperm.xlu0 %206, %v124_v41  }
 0x276   :  { %133 = vperm.xlu0 %206, %v125_v43  }
 0x2f1   :  { %v129_v44 = vpop.permute.xlu0 %128 }
 0x2f2   :  { %v136_v45 = vmul.f32 %v129_v44, %v33_v0  ;;  %v161_v49 = vrot.slane %v129_v44, %v61_v12 }
 0x2f4   :  { %v138_v46 = vsel %vm45_vm0, %v136_v45, 0.0 }
 0x2f5   :  { %v139_v47 = vrot.slane %v138_v46, 4  ;;  %v134_v48 = vpop.permute.xlu0 %133 }
 0x2f6   :  { %v137_v50 = vmul.f32 %v134_v48, %v331_v2  ;;  %v165_v51 = vrot.slane %v134_v48, %v61_v12 }
 0x2f7   :  { %v140_v52 = vadd.f32 %v139_v47, %v138_v46 }
 0x2f8   :  { %v145_v53 = vsel %vm45_vm0, %v137_v50, 0.0  ;;  %v166_v54 = vsel %vm67_vm1, %v165_v51, %v161_v49 }
 0x2f9   :  { %v141_v55 = vrot.slane %v140_v52, 2  ;;  %v146_v56 = vrot.slane %v145_v53, 4  ;;  %168 = vst.msk [vmem:[#allocation7] sm:$0x3] %vm70_vm2, %v166_v54 }
 0x2fa   :  { %246 = shalt.err (!%p243_p12)
}
 0x2fb   :  { %s247_s9 = scalar_lea.hbm %s377_s4, 32 }
 0x2fc   :  { %p248_p13 = scmp.ne.s32.totalorder %s377_s4, %s247_s9  ;;  %p251_p0 = scmp.lt.u32.totalorder %s247_s9, %s377_s4 }
 0x2fe   :  { %p253_p1 = pnand %p251_p0, %p248_p13 }
 0x300   :  { %256 = shalt.err (!%p253_p1)
}
 0x301   :  { %188 = dma.vmem_to_hbm [thread:$0]  %s186_s2, 32, %s377_s4, [#allocation8]   ;;  %v142_v57 = vadd.f32 %v141_v55, %v140_v52  ;;  %v147_v58 = vadd.f32 %v146_v56, %v145_v53  ;;  %vm156_vm3 = vcmask 254976  }
 0x302   :  { %s290_s16 = smov [#allocation6]  }
 0x303   :  { %v148_v59 = vrot.slane %v147_v58, 2  ;;  %v143_v60 = vrot.slane %v142_v57, 1  ;;  %s175_s17 = sshll.u32 %s290_s16, 4  ;;  %s176_s17 = int_to_ptr.vmem [resolvable:$true] %s175_s17 }
 0x304   :  { %s257_s18 = scalar_lea.vmem %s176_s17, 32  ;;  %p262_p3 = scmp.lt.s32.totalorder %s176_s17, %s176_s17 }
 0x305   :  { %v149_v61 = vadd.f32 %v148_v59, %v147_v58  ;;  %v144_v0 = vadd.f32 %v143_v60, %v142_v57  ;;  %p258_p2 = scmp.ne.s32.totalorder %s176_s17, %s257_s18  ;;  %p263_p4 = scmp.lt.s32.totalorder %s257_s18, %s257_s18 }
 0x307   :  { %v150_v62 = vrot.slane %v149_v61, 1  ;;  %p264_p5 = por %p263_p4, %p262_p3 }
 0x309   :  { %v151_v63 = vadd.f32 %v150_v62, %v149_v61  ;;  %p265_p6 = pnand %p264_p5, %p258_p2 }
 0x30b   :  { %v154_v1 = vsel %vm67_vm1, %v151_v63, %v144_v0 }
 0x30c   :  { %157 = vst.msk [vmem:[#allocation6] sm:$0x3] %vm156_vm3, %v154_v1 }
 0x30d   :  { %268 = shalt.err (!%p265_p6)
}
 0x30e   :  { %s269_s20 = scalar_lea.hbm %s376_s3, 32 }
 0x30f   :  { %p270_p7 = scmp.ne.s32.totalorder %s376_s3, %s269_s20  ;;  %p273_p8 = scmp.lt.u32.totalorder %s269_s20, %s376_s3 }
 0x311   :  { %p275_p9 = pnand %p273_p8, %p270_p7 }
 0x313   :  { %278 = shalt.err (!%p275_p9)
}
 0x314   :  { %178 = dma.vmem_to_hbm [thread:$0]  %s176_s17, 32, %s376_s3, [#allocation5]  }
 0x315   :  { %281 = dma.done.wait [#allocation5], 32  }
 0x316   :  { %282 = vsyncadd [#allocation5], 4294967264 }
 0x317   :  { %283 = dma.done.wait [#allocation8], 32  }
 0x318   :  { %284 = vsyncadd [#allocation8], 4294967264 }
 0x319   :  { %195 = vsyncpa [#allocation4], 1 }
 0x31a   :  { %196 = vsyncpa [#allocation5], 1 }
 0x31b   :  { %197 = vsyncpa [#allocation8], 1 }

</bundles_post_ra>
